<compile_context>
chip_gen: v7x
topology: tpu7x:2x2x1
jax: 0.10.0
libtpu: 0.0.40
codegen_flags: <defaults>
</compile_context>

<pallas_src>
import functools

import jax
import jax.numpy as jnp
from jax.experimental import pallas as pl
from jax.experimental.pallas import tpu as pltpu

LANE = 128
SUB = 8
MAX_ROW_TILE = 2048  # (2048, 128) f32 block = 1 MiB; fits all generations.


def _round_up(x, m):
    return ((x + m - 1) // m) * m


def _lsgan_reduce_kernel(x_ref, o_ref, acc_ref, *, label, rows, row_tile,
                         need_mask):
    i = pl.program_id(0)

    @pl.when(i == 0)
    def _init():
        acc_ref[...] = jnp.zeros_like(acc_ref)

    d = x_ref[...].astype(jnp.float32) - jnp.float32(label)
    sq = d * d

    if need_mask:
        # Mask rows of the (ragged) last block that fall past the real extent.
        row_ids = i * row_tile + jax.lax.broadcasted_iota(
            jnp.int32, (row_tile, LANE), 0)
        sq = jnp.where(row_ids < rows, sq, jnp.float32(0.0))

    # Sublane-axis accumulation only (pure VALU, stays in vregs): fold the
    # (row_tile, 128) tile into the resident (8, 128) accumulator.
    acc_ref[...] += jnp.sum(sq.reshape(row_tile // SUB, SUB, LANE), axis=0)

    @pl.when(i == pl.num_programs(0) - 1)
    def _finalize():
        # Single cross-lane reduction + scalar store, once per kernel call.
        o_ref[0, 0] = jnp.sum(acc_ref[...])


def _lsgan_none_kernel(x_ref, o_ref, *, label):
    d = x_ref[...].astype(jnp.float32) - jnp.float32(label)
    o_ref[...] = (d * d).astype(o_ref.dtype)


def lsgan_loss(prediction, real=True, reduction="mean", *, row_tile=None,
               min_pallas_elems=1024):
    """JAX/Pallas equivalent of LeastSquaresGenerativeAdversarialLoss.forward."""
    if reduction not in ("none", "mean", "sum"):
        raise ValueError(f"unknown reduction: {reduction}")

    label = 1.0 if real else 0.0
    dtype = prediction.dtype
    n = int(prediction.size)

    # Fallback: tiny tensors (pallas_call dispatch cost dominates) or element
    # counts not divisible by 128 lanes (would need a padding pass). XLA's
    # fused elementwise op is already at the HBM roofline for these.
    if n < min_pallas_elems or n % LANE != 0:
        d = prediction.astype(jnp.float32) - jnp.float32(label)
        sq = d * d
        if reduction == "none":
            return sq.astype(dtype)
        total = jnp.sum(sq) if reduction == "sum" else jnp.mean(sq)
        return total.astype(dtype)

    rows = n // LANE
    x2d = prediction.reshape(rows, LANE)  # lane-dense slab, no padding copy

    if row_tile is None:
        tr = min(MAX_ROW_TILE, _round_up(rows, SUB))
    else:
        tr = min(_round_up(int(row_tile), SUB), _round_up(rows, SUB))
    grid = (pl.cdiv(rows, tr),)
    need_mask = (rows % tr) != 0

    if reduction == "none":
        out2d = pl.pallas_call(
            functools.partial(_lsgan_none_kernel, label=label),
            out_shape=jax.ShapeDtypeStruct((rows, LANE), dtype),
            grid=grid,
            in_specs=[pl.BlockSpec((tr, LANE), lambda i: (i, 0))],
            out_specs=pl.BlockSpec((tr, LANE), lambda i: (i, 0)),
            compiler_params=pltpu.CompilerParams(
                dimension_semantics=("parallel",)),
        )(x2d)
        return out2d.reshape(prediction.shape)

    total = pl.pallas_call(
        functools.partial(_lsgan_reduce_kernel, label=label, rows=rows,
                          row_tile=tr, need_mask=need_mask),
        out_shape=jax.ShapeDtypeStruct((1, 1), jnp.float32),
        grid=grid,
        in_specs=[pl.BlockSpec((tr, LANE), lambda i: (i, 0))],
        out_specs=pl.BlockSpec((1, 1), lambda i: (0, 0),
                               memory_space=pltpu.SMEM),
        scratch_shapes=[pltpu.VMEM((SUB, LANE), jnp.float32)],
        compiler_params=pltpu.CompilerParams(
            dimension_semantics=("arbitrary",)),
    )(x2d)[0, 0]

    if reduction == "mean":
        total = total / jnp.float32(n)
    return total.astype(dtype)


if __name__ == "__main__":
    key = jax.random.PRNGKey(0)
    k1, k2 = jax.random.split(key)

    # Unnormalized discriminator predictions, NCHW small shape (single block).
    prediction = jax.random.normal(k1, (2, 4, 16, 16), dtype=jnp.float32)

    loss_real_mean = lsgan_loss(prediction, real=True, reduction="mean")
    loss_fake_mean = lsgan_loss(prediction, real=False, reduction="mean")
    loss_real_sum = lsgan_loss(prediction, real=True, reduction="sum")
    loss_real_none = lsgan_loss(prediction, real=True, reduction="none")

    # Second shape exercising the multi-block grid + ragged-tail masking
    # (288 rows, row_tile=64 -> 5 blocks, last block half OOB).
    pred2 = jax.random.normal(k2, (2, 4, 36, 128), dtype=jnp.float32)
    loss2_mean = lsgan_loss(pred2, real=True, reduction="mean", row_tile=64)
    loss2_sum = lsgan_loss(pred2, real=False, reduction="sum", row_tile=64)
    loss2_none = lsgan_loss(pred2, real=False, reduction="none", row_tile=64)

    jax.block_until_ready((loss_real_mean, loss_fake_mean, loss_real_sum,
                           loss_real_none, loss2_mean, loss2_sum, loss2_none))

    # Pure-JAX references.
    ref_real_mean = jnp.mean((prediction - 1.0) ** 2)
    ref_fake_mean = jnp.mean((prediction - 0.0) ** 2)
    ref_real_sum = jnp.sum((prediction - 1.0) ** 2)
    ref_real_none = (prediction - 1.0) ** 2
    ref2_mean = jnp.mean((pred2 - 1.0) ** 2)
    ref2_sum = jnp.sum((pred2 - 0.0) ** 2)
    ref2_none = (pred2 - 0.0) ** 2

    assert jnp.allclose(loss_real_mean, ref_real_mean, rtol=1e-5, atol=1e-5)
    assert jnp.allclose(loss_fake_mean, ref_fake_mean, rtol=1e-5, atol=1e-5)
    assert jnp.allclose(loss_real_sum, ref_real_sum, rtol=1e-4, atol=1e-4)
    assert loss_real_none.shape == prediction.shape
    assert jnp.allclose(loss_real_none, ref_real_none, rtol=1e-5, atol=1e-5)

    assert jnp.allclose(loss2_mean, ref2_mean, rtol=1e-5, atol=1e-5)
    assert jnp.allclose(loss2_sum, ref2_sum, rtol=1e-4, atol=1e-4)
    assert loss2_none.shape == pred2.shape
    assert jnp.allclose(loss2_none, ref2_none, rtol=1e-5, atol=1e-5)

    print("KERNEL_OK")
</pallas_src>

<mosaic_0001>
module attributes {stable_mosaic.version = 11 : i64} {
  func.func @_lsgan_reduce_kernel(%arg0: i32, %arg1: memref<16x128xf32, #tpu.memory_space<vmem>>, %arg2: memref<1x1xf32, #tpu.memory_space<smem>>, %arg3: memref<8x128xf32, #tpu.memory_space<vmem>>) attributes {dimension_semantics = [#tpu.dimension_semantics<arbitrary>], iteration_bounds = array<i64: 1>, scalar_prefetch = 0 : i64, scratch_operands = 1 : i64, tpu.core_type = #tpu.core_type<tc>, window_params = [{transform_indices = @transform_0, window_bounds = array<i64: 16, 128>}, {transform_indices = @transform_1, window_bounds = array<i64: 1, 1>}]} {
    %c0_i32 = arith.constant 0 : i32
    %0 = arith.cmpi eq, %arg0, %c0_i32 : i32
    %1 = arith.extui %0 : i1 to i32
    %c0_i32_0 = arith.constant 0 : i32
    %2 = arith.cmpi ne, %1, %c0_i32_0 : i32
    scf.if %2 {
      %cst_9 = arith.constant 0.000000e+00 : f32
      %15 = vector.broadcast %cst_9 : f32 to vector<8x128xf32>
      %c0_10 = arith.constant 0 : index
      %c0_11 = arith.constant 0 : index
      %16 = vector.load %arg3[%c0_10, %c0_11] : memref<8x128xf32, #tpu.memory_space<vmem>>, vector<8x128xf32>
      tpu.vector_store %arg3[%c0_10, %c0_11], %15 {strides = array<i32>} : memref<8x128xf32, #tpu.memory_space<vmem>>, vector<8x128xf32>,
    } else {
    }
    %c0 = arith.constant 0 : index
    %c0_1 = arith.constant 0 : index
    %3 = vector.load %arg1[%c0, %c0_1] : memref<16x128xf32, #tpu.memory_space<vmem>>, vector<16x128xf32>
    %cst = arith.constant 1.000000e+00 : f32
    %4 = vector.broadcast %cst : f32 to vector<16x128xf32>
    %5 = arith.subf %3, %4 : vector<16x128xf32>
    %6 = arith.mulf %5, %5 : vector<16x128xf32>
    %c0_2 = arith.constant 0 : index
    %c0_3 = arith.constant 0 : index
    %7 = vector.load %arg3[%c0_2, %c0_3] : memref<8x128xf32, #tpu.memory_space<vmem>>, vector<8x128xf32>
    %8 = vector.shape_cast %6 : vector<16x128xf32> to vector<2x8x128xf32>
    %cst_4 = arith.constant dense<0.000000e+00> : vector<8x128xf32>
    %9 = vector.multi_reduction <add>, %8, %cst_4 [0] : vector<2x8x128xf32> to vector<8x128xf32>
    %10 = arith.addf %7, %9 : vector<8x128xf32>
    %c0_5 = arith.constant 0 : index
    %c0_6 = arith.constant 0 : index
    %11 = vector.load %arg3[%c0_5, %c0_6] : memref<8x128xf32, #tpu.memory_space<vmem>>, vector<8x128xf32>
    tpu.vector_store %arg3[%c0_5, %c0_6], %10 {strides = array<i32>} : memref<8x128xf32, #tpu.memory_space<vmem>>, vector<8x128xf32>,
    %c0_i32_7 = arith.constant 0 : i32
    %12 = arith.cmpi eq, %arg0, %c0_i32_7 : i32
    %13 = arith.extui %12 : i1 to i32
    %c0_i32_8 = arith.constant 0 : i32
    %14 = arith.cmpi ne, %13, %c0_i32_8 : i32
    scf.if %14 {
      %c0_9 = arith.constant 0 : index
      %c0_10 = arith.constant 0 : index
      %15 = vector.load %arg3[%c0_9, %c0_10] : memref<8x128xf32, #tpu.memory_space<vmem>>, vector<8x128xf32>
      %16 = vector.shape_cast %15 : vector<8x128xf32> to vector<1x8x128xf32>
      %cst_11 = arith.constant dense<0.000000e+00> : vector<1xf32>
      %17 = vector.multi_reduction <add>, %16, %cst_11 [1, 2] : vector<1x8x128xf32> to vector<1xf32>
      %18 = vector.shape_cast %17 : vector<1xf32> to vector<1x1x1xf32>
      %19 = vector.extract %18[0, 0, 0] : f32 from vector<1x1x1xf32>
      %c0_12 = arith.constant 0 : index
      %c0_13 = arith.constant 0 : index
      %20 = memref.load %arg2[%c0_12, %c0_13] : memref<1x1xf32, #tpu.memory_space<smem>>
      memref.store %19, %arg2[%c0_12, %c0_13] : memref<1x1xf32, #tpu.memory_space<smem>>
    } else {
    }
    return
  }
  func.func @transform_0(%arg0: i32) -> (i32, i32) {
    %c0_i32 = arith.constant 0 : i32
    %c0_i32_0 = arith.constant 0 : i32
    return %arg0, %c0_i32 : i32, i32
  }
  func.func @transform_1(%arg0: i32) -> (i32, i32) {
    %c0_i32 = arith.constant 0 : i32
    %c0_i32_0 = arith.constant 0 : i32
    %c0_i32_1 = arith.constant 0 : i32
    return %c0_i32, %c0_i32_0 : i32, i32
  }
}

</mosaic_0001>

<bundles_post_ra>
// kernel: tpu_custom_call.1
= control target key start
LH: loop header
LB: loop body
LE: loop exit
PB: predicated region body
PF: predicated region fallthrough
CT: control target
= control target key end

     0   :  { %6 = vsyncpa [#allocation4], 0  ;;  %s149_s0 = inlined_call_operand.hbm [shape: f32[16,128], index: 0, kind: input, shape index: {}]   ;;  %s150_s1 = inlined_call_operand.hbm [shape: f32[1,1], index: 1, kind: output, shape index: {}]  }
   0x1   :  { %7 = vsyncpa [#allocation5], 0  ;;  %s111_s6 = smov [#allocation3]   ;;  %s75_s10 = scalar_lea.hbm %s149_s0, 256 }
   0x2   :  { %s13_s7 = sshll.u32 %s111_s6, 4  ;;  %p76_p0 = scmp.ne.s32.totalorder %s149_s0, %s75_s10  ;;  %s14_s7 = int_to_ptr.vmem [resolvable:$true] %s13_s7 }
   0x3   :  { %p79_p1 = scmp.lt.u32.totalorder %s75_s10, %s149_s0 }
   0x5   :  { %p81_p2 = pnand %p79_p1, %p76_p0 }
   0x7   :  { %84 = shalt.err (!%p81_p2)
}
   0x8   :  { %s85_s15 = scalar_lea.vmem %s14_s7, 256  ;;  %p90_p4 = scmp.lt.s32.totalorder %s14_s7, %s14_s7 }
   0x9   :  { %p86_p3 = scmp.ne.s32.totalorder %s14_s7, %s85_s15  ;;  %p91_p5 = scmp.lt.s32.totalorder %s85_s15, %s85_s15 }
   0xb   :  { %p92_p6 = por %p91_p5, %p90_p4 }
   0xd   :  { %p93_p7 = pnand %p92_p6, %p86_p3 }
   0xf   :  { %96 = shalt.err (!%p93_p7)
}
  0x10   :  { %s112_s16 = smov 128   ;;  %s113_s17 = smov 8  }
  0x11   :  { %19 = dma.hbm_to_vmem [thread:$0]  %s149_s0, 256, %s14_s7, [#allocation4], %s112_s16, %s112_s16, %s113_s17  }
  0x12   :  { %107 = dma.done.wait [#allocation4], 256  }
  0x13   :  { %108 = vsyncadd [#allocation4], 4294967040  ;;  %v28_v0 = vld [vmem:[#allocation3] sm:$0xff]  ;;  %v29_v1 = vld [vmem:[#allocation3 + $0x8] sm:$0xff]  ;;  %s97_s22 = scalar_lea.hbm %s150_s1, 16 }
  0x14   :  { %v67_v2 = vadd.f32 -1.0, %v28_v0  ;;  %v68_v3 = vadd.f32 -1.0, %v29_v1  ;;  %p98_p8 = scmp.ne.s32.totalorder %s150_s1, %s97_s22  ;;  %p101_p9 = scmp.lt.u32.totalorder %s97_s22, %s150_s1 }
  0x16   :  { %v32_v4 = vmul.f32 %v67_v2, %v67_v2  ;;  %v33_v5 = vmul.f32 %v68_v3, %v68_v3  ;;  %p103_p10 = pnand %p101_p9, %p98_p8 }
  0x18   :  { %v35_v6 = vadd.f32 %v33_v5, %v32_v4 }
  0x1a   :  { %42 = vadd.xlane.f32.xlu0 %v35_v6 }
  0xa7   :  { %v43_v7 = vpop.xlane.xlu0 %42 }
  0xa8   :  { %v44_v8 = vrot.slane %v43_v7, 4 }
  0xaa   :  { %v45_v9 = vadd.f32 %v44_v8, %v43_v7 }
  0xac   :  { %v46_v10 = vrot.slane %v45_v9, 2 }
  0xae   :  { %v47_v11 = vadd.f32 %v46_v10, %v45_v9 }
  0xb0   :  { %v48_v12 = vrot.slane %v47_v11, 1 }
  0xb2   :  { %v49_v13 = vadd.f32 %v48_v12, %v47_v11 }
  0xb4   :  { %69 = vpush %v49_v13 }
  0xe5   :  { %s70_s20 = spop %69 }
  0xe6   :  { %52 = sst [smem:[#allocation6]] %s70_s20 }
  0xe7   :  { %106 = shalt.err (!%p103_p10)
}
  0xe8   :  { %s114_s27 = smov [#allocation6]  }
  0xe9   :  { %60 = dma.smem_to_hbm %s114_s27, 16, %s150_s1, [#allocation5]  }
  0xea   :  { %109 = dma.done.wait [#allocation5], 16  }
  0xeb   :  { %110 = vsyncadd [#allocation5], 4294967280 }
  0xec   :  { %64 = sfence }
  0xed   :  { %65 = vsyncpa [#allocation4], 1 }
  0xee   :  { %66 = vsyncpa [#allocation5], 1 }

</bundles_post_ra>
